<compile_context>
chip_gen: v6e
topology: v6e:2x2x1
jax: 0.10.0
libtpu: 0.0.40
codegen_flags: <defaults>
</compile_context>

<pallas_src>
import functools

import jax
import jax.numpy as jnp
from jax.experimental import pallas as pl
from jax.experimental.pallas import tpu as pltpu

_NEG_SLOPE = 0.2


def _leaky_relu(y):
    return jnp.where(y >= 0.0, y, _NEG_SLOPE * y)


# ---------------------------------------------------------------------------
# Kernel bodies
# ---------------------------------------------------------------------------
def recommender_kernel_fused(x_ref, w_ref, b_ref, o_ref):
    """Whole K reduction in one shot: matmul + bias + LeakyReLU + store."""
    y = jnp.dot(x_ref[...], w_ref[...], preferred_element_type=jnp.float32)
    y = y + b_ref[...]                       # (tm, tn) + (1, tn) broadcast
    o_ref[...] = _leaky_relu(y).astype(o_ref.dtype)


def recommender_kernel_acc(x_ref, w_ref, b_ref, o_ref, acc_ref):
    """K is tiled on grid axis 2; persistent f32 accumulator in VMEM."""
    k = pl.program_id(2)

    @pl.when(k == 0)
    def _init():
        acc_ref[...] = jnp.zeros_like(acc_ref)

    acc_ref[...] += jnp.dot(
        x_ref[...], w_ref[...], preferred_element_type=jnp.float32
    )

    @pl.when(k == pl.num_programs(2) - 1)
    def _finalize():
        y = acc_ref[...] + b_ref[...]        # (tm, tn) + (1, tn) broadcast
        o_ref[...] = _leaky_relu(y).astype(o_ref.dtype)


# ---------------------------------------------------------------------------
# Tile selection (respects the (8, 128) layout constraint)
# ---------------------------------------------------------------------------
def _pick_tile(dim, target, align):
    """Largest `align`-multiple divisor of `dim` that is <= target.

    Falls back to the full dim (always a legal block shape)."""
    if dim <= target:
        return dim
    start = target - (target % align)
    for t in range(start, 0, -align):
        if dim % t == 0:
            return t
    return dim


# ---------------------------------------------------------------------------
# Host wrapper
# ---------------------------------------------------------------------------
@functools.partial(jax.jit, static_argnames=("tm", "tn", "tk"))
def recommender_forward(outputs, w, b, *, tm=None, tn=None, tk=None):
    """outputs: (B, out_dim), w: (out_dim, poi_size), b: (poi_size,)."""
    B, K = outputs.shape
    Kw, N = w.shape
    assert K == Kw, (K, Kw)
    assert b.shape == (N,), b.shape

    # Sublane tiles -> multiples of 8 (or full dim); lane tiles -> multiples of
    # 128 (or full dim).  tk appears both as a lane dim (x block) and a sublane
    # dim (w block), so it is aligned to 128 unless it equals K.
    tm = tm if tm is not None else _pick_tile(B, 256, 8)
    tn = tn if tn is not None else _pick_tile(N, 512, 128)
    tk = tk if tk is not None else _pick_tile(K, 512, 128)
    assert B % tm == 0 and N % tn == 0 and K % tk == 0

    b2d = b.reshape(1, N)
    n_k = K // tk
    grid_mn = (B // tm, N // tn)

    if n_k == 1:
        # Single K step: no accumulator, no phase gates.
        return pl.pallas_call(
            recommender_kernel_fused,
            out_shape=jax.ShapeDtypeStruct((B, N), outputs.dtype),
            grid_spec=pltpu.PrefetchScalarGridSpec(
                num_scalar_prefetch=0,
                grid=grid_mn,
                in_specs=[
                    pl.BlockSpec((tm, K), lambda i, j: (i, 0)),   # activations
                    pl.BlockSpec((K, tn), lambda i, j: (0, j)),   # weights
                    pl.BlockSpec((1, tn), lambda i, j: (0, j)),   # bias row
                ],
                out_specs=pl.BlockSpec((tm, tn), lambda i, j: (i, j)),
            ),
            compiler_params=pltpu.CompilerParams(
                dimension_semantics=("parallel", "parallel"),
            ),
        )(outputs, w, b2d)

    # Large K: tile the reduction on the innermost grid axis.
    return pl.pallas_call(
        recommender_kernel_acc,
        out_shape=jax.ShapeDtypeStruct((B, N), outputs.dtype),
        grid_spec=pltpu.PrefetchScalarGridSpec(
            num_scalar_prefetch=0,
            grid=grid_mn + (n_k,),
            in_specs=[
                pl.BlockSpec((tm, tk), lambda i, j, k: (i, k)),   # activations
                pl.BlockSpec((tk, tn), lambda i, j, k: (k, j)),   # weights
                pl.BlockSpec((1, tn), lambda i, j, k: (0, j)),    # bias row
            ],
            out_specs=pl.BlockSpec((tm, tn), lambda i, j, k: (i, j)),
            scratch_shapes=[pltpu.VMEM((tm, tn), jnp.float32)],
        ),
        compiler_params=pltpu.CompilerParams(
            dimension_semantics=("parallel", "parallel", "arbitrary"),
        ),
    )(outputs, w, b2d)


def recommender_ref(outputs, w, b):
    y = outputs @ w + b
    return jnp.where(y >= 0.0, y, _NEG_SLOPE * y)


if __name__ == "__main__":
    # Small module config (exercises the N-tile grid axis + fused path).
    out_dim = 64      # hidden size fed into the recommender
    poi_size = 256    # number of POIs (output vocabulary)
    B = 16            # batch of sequence outputs

    key = jax.random.PRNGKey(0)
    k_x, k_w, k_b = jax.random.split(key, 3)

    # torch.nn.Linear stores weight as (poi_size, out_dim); the kernel consumes
    # its transpose so the matmul is a plain (B, K) @ (K, N).
    weight = jax.random.normal(k_w, (poi_size, out_dim), dtype=jnp.float32) * 0.1
    bias = jax.random.normal(k_b, (poi_size,), dtype=jnp.float32) * 0.1
    w = weight.T  # (out_dim, poi_size)

    outputs = jax.random.normal(k_x, (B, out_dim), dtype=jnp.float32)

    out = recommender_forward(outputs, w, bias)
    out = jax.block_until_ready(out)

    ref = recommender_ref(outputs, w, bias)
    assert out.shape == (B, poi_size), out.shape
    assert jnp.allclose(out, ref, atol=1e-5, rtol=1e-5), "mismatch vs reference"

    # Also exercise the K-tiled (accumulator) path for coverage.
    out_acc = jax.block_until_ready(
        recommender_forward(outputs, w, bias, tm=B, tn=128, tk=32)
    )
    assert jnp.allclose(out_acc, ref, atol=1e-5, rtol=1e-5), "mismatch (acc path)"

    print("KERNEL_OK")
</pallas_src>

<mosaic_0001>
module attributes {stable_mosaic.version = 11 : i64} {
  func.func @recommender_kernel_fused(%arg0: i32, %arg1: i32, %arg2: memref<16x64xf32, #tpu.memory_space<vmem>>, %arg3: memref<64x256xf32, #tpu.memory_space<vmem>>, %arg4: memref<1x256xf32, #tpu.memory_space<vmem>>, %arg5: memref<16x256xf32, #tpu.memory_space<vmem>>) attributes {dimension_semantics = [#tpu.dimension_semantics<parallel>, #tpu.dimension_semantics<parallel>], iteration_bounds = array<i64: 1, 1>, scalar_prefetch = 0 : i64, scratch_operands = 0 : i64, tpu.core_type = #tpu.core_type<tc>, window_params = [{transform_indices = @transform_0, window_bounds = array<i64: 16, 64>}, {transform_indices = @transform_1, window_bounds = array<i64: 64, 256>}, {transform_indices = @transform_2, window_bounds = array<i64: 1, 256>}, {transform_indices = @transform_3, window_bounds = array<i64: 16, 256>}]} {
    %c0 = arith.constant 0 : index
    %c0_0 = arith.constant 0 : index
    %0 = vector.load %arg2[%c0, %c0_0] : memref<16x64xf32, #tpu.memory_space<vmem>>, vector<16x64xf32>
    %c0_1 = arith.constant 0 : index
    %c0_2 = arith.constant 0 : index
    %1 = vector.load %arg3[%c0_1, %c0_2] : memref<64x256xf32, #tpu.memory_space<vmem>>, vector<64x256xf32>
    %cst = arith.constant dense<0.000000e+00> : vector<16x256xf32>
    %2 = tpu.matmul %0, %1, %cst {dimension_numbers = #tpu.dot_dimension_numbers<[1], [0], [0], [1], [0, 0, 1, 1], [], []>} : vector<16x64xf32>, vector<64x256xf32>, vector<16x256xf32> -> vector<16x256xf32>
    %c0_3 = arith.constant 0 : index
    %c0_4 = arith.constant 0 : index
    %3 = vector.load %arg4[%c0_3, %c0_4] : memref<1x256xf32, #tpu.memory_space<vmem>>, vector<1x256xf32>
    %4 = vector.broadcast %3 : vector<1x256xf32> to vector<16x256xf32>
    %5 = arith.addf %2, %4 : vector<16x256xf32>
    %cst_5 = arith.constant 0.000000e+00 : f32
    %6 = vector.broadcast %cst_5 : f32 to vector<16x256xf32>
    %7 = arith.cmpf oge, %5, %6 : vector<16x256xf32>
    %cst_6 = arith.constant 2.000000e-01 : f32
    %8 = vector.broadcast %cst_6 : f32 to vector<16x256xf32>
    %9 = arith.mulf %8, %5 : vector<16x256xf32>
    %10 = arith.select %7, %5, %9 : vector<16x256xi1>, vector<16x256xf32>
    %c0_7 = arith.constant 0 : index
    %c0_8 = arith.constant 0 : index
    %11 = vector.load %arg5[%c0_7, %c0_8] : memref<16x256xf32, #tpu.memory_space<vmem>>, vector<16x256xf32>
    tpu.vector_store %arg5[%c0_7, %c0_8], %10 {strides = array<i32>} : memref<16x256xf32, #tpu.memory_space<vmem>>, vector<16x256xf32>,
    return
  }
  func.func @transform_0(%arg0: i32, %arg1: i32) -> (i32, i32) {
    %c0_i32 = arith.constant 0 : i32
    %c0_i32_0 = arith.constant 0 : i32
    return %arg0, %c0_i32 : i32, i32
  }
  func.func @transform_1(%arg0: i32, %arg1: i32) -> (i32, i32) {
    %c0_i32 = arith.constant 0 : i32
    %c0_i32_0 = arith.constant 0 : i32
    return %c0_i32, %arg1 : i32, i32
  }
  func.func @transform_2(%arg0: i32, %arg1: i32) -> (i32, i32) {
    %c0_i32 = arith.constant 0 : i32
    %c0_i32_0 = arith.constant 0 : i32
    return %c0_i32, %arg1 : i32, i32
  }
  func.func @transform_3(%arg0: i32, %arg1: i32) -> (i32, i32) {
    %c0_i32 = arith.constant 0 : i32
    return %arg0, %arg1 : i32, i32
  }
}

</mosaic_0001>

<bundles_post_ra>
// kernel: recommender_forward.1
= control target key start
LH: loop header
LB: loop body
LE: loop exit
PB: predicated region body
PF: predicated region fallthrough
CT: control target
= control target key end

     0   :  { %8 = vsyncpa [#allocation3], 0  ;;  %s329_s0 = inlined_call_operand.hbm [shape: f32[16,64], index: 0, kind: input, shape index: {}]   ;;  %s330_s1 = inlined_call_operand.hbm [shape: f32[64,256], index: 1, kind: input, shape index: {}]   ;;  %s331_s2 = inlined_call_operand.vmem [shape: f32[1,256], index: 2, kind: input, shape index: {}]   ;;  %s332_s3 = inlined_call_operand.hbm [shape: f32[16,256], index: 3, kind: output, shape index: {}]  }
   0x1   :  { %9 = vsyncpa [#allocation6], 0 }
   0x2   :  { %10 = vsyncpa [#allocation4], 0  ;;  %s283_s12 = smov [#allocation2]  }
   0x3   :  { %s16_s13 = sshll.u32 %s283_s12, 4  ;;  %s17_s13 = int_to_ptr.vmem [resolvable:$true] %s16_s13 }
   0x4   :  { %s225_s14 = scalar_lea.vmem %s17_s13, 256  ;;  %p230_p1 = scmp.lt.s32.totalorder %s17_s13, %s17_s13 }
   0x5   :  { %p226_p0 = scmp.ne.s32.totalorder %s17_s13, %s225_s14  ;;  %p231_p2 = scmp.lt.s32.totalorder %s225_s14, %s225_s14 }
   0x7   :  { %p232_p3 = por %p231_p2, %p230_p1 }
   0x9   :  { %p233_p4 = pnand %p232_p3, %p226_p0 }
   0xb   :  { %236 = shalt.err (!%p233_p4)
}
   0xc   :  { %s284_s15 = smov 128   ;;  %s285_s16 = smov 8  }
   0xd   :  { %22 = dma.hbm_to_vmem [thread:$0]  %s329_s0, 256, %s17_s13, [#allocation3], %s284_s15, %s284_s15, %s285_s16  }
   0xe   :  { %s286_s19 = smov [#allocation5]  }
   0xf   :  { %s28_s20 = sshll.u32 %s286_s19, 4  ;;  %s29_s20 = int_to_ptr.vmem [resolvable:$true] %s28_s20 }
  0x10   :  { %s245_s21 = scalar_lea.vmem %s29_s20, 2048  ;;  %p250_p6 = scmp.lt.s32.totalorder %s29_s20, %s29_s20 }
  0x11   :  { %p246_p5 = scmp.ne.s32.totalorder %s29_s20, %s245_s21  ;;  %p251_p7 = scmp.lt.s32.totalorder %s245_s21, %s245_s21 }
  0x13   :  { %p252_p8 = por %p251_p7, %p250_p6 }
  0x15   :  { %p253_p9 = pnand %p252_p8, %p246_p5 }
  0x17   :  { %256 = shalt.err (!%p253_p9)
}
  0x18   :  { %s287_s22 = smov 256   ;;  %s288_s23 = smov 16  }
  0x19   :  { %34 = dma.hbm_to_vmem [thread:$0]  %s330_s1, 2048, %s29_s20, [#allocation6], %s287_s22, %s287_s22, %s288_s23  }
  0x1a   :  { %277 = dma.done.wait [#allocation3], 256  }
  0x1b   :  { %278 = vsyncadd [#allocation3], 4294967040 }
  0x1c   :  { %279 = dma.done.wait [#allocation6], 2048  }
  0x1d   :  { %280 = vsyncadd [#allocation6], 4294965248  ;;  %v289_v0 = vmov 0.0   ;;  %v60_v1 = vld [vmem:[#allocation5 + $0x78] sm:$0xff]  ;;  %v59_v2 = vld [vmem:[#allocation5 + $0x70] sm:$0xff]  ;;  %vm73_vm0 = vcmask 523264   ;;  %v63_v19 = vlaneseq }
  0x1e   :  { %144 = vmatprep.mubr.f32.mxu0 %v289_v0  ;;  %150 = vmatprep.mubr.f32.mxu1 %v289_v0  ;;  %v58_v3 = vld [vmem:[#allocation5 + $0x68] sm:$0xff]  ;;  %v57_v4 = vld [vmem:[#allocation5 + $0x60] sm:$0xff]  ;;  %v56_v5 = vld [vmem:[#allocation5 + $0x58] sm:$0xff]  ;;  %s290_s26 = smov [#allocation7]  }
  0x1f   :  { %96 = vmatprep.subr.mxu0 %v60_v1  ;;  %193 = vmatprep.subr.mxu1 %v60_v1  ;;  %v55_v6 = vld [vmem:[#allocation5 + $0x50] sm:$0xff]  ;;  %v54_v7 = vld [vmem:[#allocation5 + $0x48] sm:$0xff]  ;;  %v53_v8 = vld [vmem:[#allocation5 + $0x40] sm:$0xff]  ;;  %v64_v20 = vshrl.u32 %v63_v19, 7  ;;  %s178_s27 = sshll.u32 %s290_s26, 4  ;;  %s179_s27 = int_to_ptr.vmem [resolvable:$true] %s178_s27 }
  0x20   :  { %97 = vmatpush1.msra.mxu0 %v59_v2  ;;  %201 = vmatpush1.msra.mxu1 %v59_v2  ;;  %v52_v9 = vld [vmem:[#allocation5 + $0x38] sm:$0xff]  ;;  %v51_v10 = vld [vmem:[#allocation5 + $0x30] sm:$0xff]  ;;  %v50_v11 = vld [vmem:[#allocation5 + $0x28] sm:$0xff]  ;;  %p262_p11 = scmp.lt.s32.totalorder %s179_s27, %s179_s27 }
  0x21   :  { %98 = vmatprep.subr.mxu0 %v58_v3  ;;  %194 = vmatprep.subr.mxu1 %v58_v3  ;;  %v49_v12 = vld [vmem:[#allocation5 + $0x20] sm:$0xff]  ;;  %v48_v13 = vld [vmem:[#allocation5 + $0x18] sm:$0xff]  ;;  %v47_v14 = vld [vmem:[#allocation5 + $0x10] sm:$0xff]  ;;  %v65_v21 = vsub.s32 0, %v64_v20  ;;  %v69_v23 = vsub.s32 1, %v64_v20 }
  0x22   :  { %99 = vmatpush1.msra.mxu0 %v57_v4  ;;  %202 = vmatpush1.msra.mxu1 %v57_v4  ;;  %v46_v15 = vld [vmem:[#allocation5 + $0x8] sm:$0xff]  ;;  %v45_v16 = vld [vmem:[#allocation5] sm:$0xff]  ;;  %v43_v17 = vld [vmem:[#allocation2] sm:$0xff] }
  0x23   :  { %100 = vmatprep.subr.mxu0 %v56_v5  ;;  %195 = vmatprep.subr.mxu1 %v56_v5  ;;  %v44_v18 = vld [vmem:[#allocation2 + $0x8] sm:$0xff]  ;;  %v61_v22 = vld [vmem:[%s331_s2] sm:$0x3]  ;;  %s257_s2 = scalar_lea.vmem %s179_s27, 512 }
  0x24   :  { %101 = vmatpush1.msra.mxu0 %v55_v6  ;;  %203 = vmatpush1.msra.mxu1 %v55_v6  ;;  %v66_v24 = vrot.slane %v61_v22, %v65_v21  ;;  %v70_v27 = vrot.slane %v61_v22, %v69_v23  ;;  %p258_p10 = scmp.ne.s32.totalorder %s179_s27, %s257_s2  ;;  %p263_p12 = scmp.lt.s32.totalorder %s257_s2, %s257_s2 }
  0x25   :  { %102 = vmatprep.subr.mxu0 %v54_v7  ;;  %196 = vmatprep.subr.mxu1 %v54_v7 }
  0x26   :  { %103 = vmatpush1.msra.mxu0 %v53_v8  ;;  %204 = vmatpush1.msra.mxu1 %v53_v8  ;;  %p264_p13 = por %p263_p12, %p262_p11 }
  0x27   :  { %104 = vmatprep.subr.mxu0 %v52_v9  ;;  %197 = vmatprep.subr.mxu1 %v52_v9 }
  0x28   :  { %105 = vmatpush1.msra.mxu0 %v51_v10  ;;  %205 = vmatpush1.msra.mxu1 %v51_v10  ;;  %p265_p0 = pnand %p264_p13, %p258_p10 }
  0x29   :  { %106 = vmatprep.subr.mxu0 %v50_v11  ;;  %198 = vmatprep.subr.mxu1 %v50_v11 }
  0x2a   :  { %107 = vmatpush1.msra.mxu0 %v49_v12  ;;  %206 = vmatpush1.msra.mxu1 %v49_v12 }
  0x2b   :  { %108 = vmatprep.subr.mxu0 %v48_v13  ;;  %199 = vmatprep.subr.mxu1 %v48_v13 }
  0x2c   :  { %109 = vmatpush1.msra.mxu0 %v47_v14  ;;  %207 = vmatpush1.msra.mxu1 %v47_v14 }
  0x2d   :  { %110 = vmatprep.subr.mxu0 %v46_v15  ;;  %200 = vmatprep.subr.mxu1 %v46_v15 }
  0x2e   :  { %111 = vmatpush1.msra.mxu0 %v45_v16  ;;  %208 = vmatpush1.msra.mxu1 %v45_v16 }
  0x2f   :  { %191 = vmatmul.mubr.msk.f32.vlgmr.msra.gmra.mxu0 %vm73_vm0, %v43_v17  ;;  %192 = vmatmul.mubr.msk.f32.vlgmr.msra.gmra.mxu1 %vm73_vm0, %v44_v18 }
  0xef   :  { %v146_v25 = vpop.f32.mrf.mxu0  ;;  %v152_v26 = vpop.f32.mrf.mxu1 }
  0xf0   :  { %v147_v28 = vadd.f32 %v146_v25, %v66_v24  ;;  %v153_v29 = vadd.f32 %v152_v26, %v66_v24 }
  0xf1   :  { %v148_v30 = vpop.f32.mrf.mxu0  ;;  %v154_v31 = vpop.f32.mrf.mxu1 }
  0xf2   :  { %vm157_vm1 = vcmp.ge.f32.partialorder %v147_v28, 0.0  ;;  %v161_v32 = vmul.f32 0.2, %v147_v28  ;;  %vm159_vm2 = vcmp.ge.f32.partialorder %v153_v29, 0.0  ;;  %v163_v33 = vmul.f32 0.2, %v153_v29 }
  0xf3   :  { %v149_v34 = vadd.f32 %v148_v30, %v70_v27  ;;  %v155_v35 = vadd.f32 %v154_v31, %v70_v27 }
  0xf4   :  { %v165_v36 = vsel %vm157_vm1, %v147_v28, %v161_v32  ;;  %v167_v37 = vsel %vm159_vm2, %v153_v29, %v163_v33 }
  0xf5   :  { %169 = vst [vmem:[#allocation7] sm:$0xff] %v165_v36  ;;  %171 = vst [vmem:[#allocation7 + $0x10] sm:$0xff] %v167_v37  ;;  %vm158_vm3 = vcmp.ge.f32.partialorder %v149_v34, 0.0  ;;  %v162_v38 = vmul.f32 0.2, %v149_v34  ;;  %vm160_vm4 = vcmp.ge.f32.partialorder %v155_v35, 0.0 }
  0xf6   :  { %v164_v39 = vmul.f32 0.2, %v155_v35 }
  0xf7   :  { %v166_v40 = vsel %vm158_vm3, %v149_v34, %v162_v38 }
  0xf8   :  { %v168_v41 = vsel %vm160_vm4, %v155_v35, %v164_v39  ;;  %170 = vst [vmem:[#allocation7 + $0x8] sm:$0xff] %v166_v40 }
  0xf9   :  { %172 = vst [vmem:[#allocation7 + $0x18] sm:$0xff] %v168_v41 }
  0xfa   :  { %268 = shalt.err (!%p265_p0)
}
  0xfb   :  { %184 = dma.vmem_to_hbm [thread:$0]  %s179_s27, 512, %s332_s3, [#allocation4], %s287_s22, %s287_s22, %s288_s23  }
  0xfc   :  { %281 = dma.done.wait [#allocation4], 512  }
  0xfd   :  { %282 = vsyncadd [#allocation4], 4294966784 }
  0xfe   :  { %188 = vsyncpa [#allocation3], 1 }
  0xff   :  { %189 = vsyncpa [#allocation6], 1 }
 0x100   :  { %190 = vsyncpa [#allocation4], 1 }

</bundles_post_ra>
